<compile_context>
chip_gen: v5e
topology: v5e:2x2
jax: 0.10.0
libtpu: 0.0.40
codegen_flags: <defaults>
</compile_context>

<pallas_src>
import numpy as np
import jax
import jax.numpy as jnp
from jax.experimental import pallas as pl
from jax.experimental.pallas import tpu as pltpu

LANE = 128        # pad channel / class / tap dims to full lane width (lane-dense vregs)
NEG_BIG = -1e30   # stands in for -inf on padded logit lanes


# ---------------------------------------------------------------------------
# Fused kernel: (pre-built im2col) -> one stacked-conv matmul -> bias+ReLU
#               -> fused masked max-pool -> fc1 (bf16xbf16) -> log_softmax
# ---------------------------------------------------------------------------
def fused_cnn_kernel(p_ref, wc_ref, bc_ref, mask_ref, wf_ref, bf_ref, o_ref):
    # p_ref    (TB, T_pad, KE_pad) bf16  lane-dense im2col patches (taps/time zero-padded)
    # wc_ref   (KE_pad, Npad)      bf16  all conv weights stacked (taps zero-padded to Kmax)
    # bc_ref   (1, Npad)           f32   stacked conv biases (padded lanes 0)
    # mask_ref (T_pad, Npad)       f32   1.0 where position t is valid for that lane's conv
    # wf_ref   (Npad, Opad)        bf16  fc1 weight, zero-padded rows/cols
    # bf_ref   (1, Opad)           f32   fc1 bias; padded lanes = NEG_BIG (acts as -inf)
    # o_ref    (TB, Opad)          f32   log_softmax output (padded lanes sliced off outside)
    TB, T_pad, KE_pad = p_ref.shape
    N_pad = wc_ref.shape[1]

    # Single MXU matmul over M = TB*T_pad rows (T_pad is a multiple of 8, KE_pad/N_pad
    # are multiples of 128, so the reshapes are layout-preserving).
    patches2d = p_ref[...].reshape(TB * T_pad, KE_pad)                 # bf16
    acc = jnp.dot(patches2d, wc_ref[...],
                  preferred_element_type=jnp.float32)                  # (TB*T_pad, Npad) f32
    acc = jnp.maximum(acc + bc_ref[...], 0.0)                          # bias + ReLU
    acc = acc.reshape(TB, T_pad, N_pad)

    # Fused mask + max-pool over time: masking-to-zero is exact because ReLU output >= 0
    # and every conv has >= 1 valid position (asserted in pack_params: L >= Kmax).
    # TODO(synk): for very long sequences, chunk T with a running max to shrink the temp.
    pooled = jnp.max(jnp.where(mask_ref[...] > 0.0, acc, 0.0), axis=1)  # (TB, Npad) f32

    # fc1 (native bf16 x bf16 -> f32) + numerically stable log_softmax
    # (padded logit lanes carry NEG_BIG bias -> exp == 0, they never win the max).
    logits = jnp.dot(pooled.astype(jnp.bfloat16), wf_ref[...],
                     preferred_element_type=jnp.float32) + bf_ref[...]  # (TB, Opad)
    m = jnp.max(logits, axis=-1, keepdims=True)
    shifted = logits - m
    lse = jnp.log(jnp.sum(jnp.exp(shifted), axis=-1, keepdims=True))
    o_ref[...] = (shifted - lse).astype(o_ref.dtype)


# ---------------------------------------------------------------------------
# Batch-tile / VMEM-budget selection (per-generation via get_tpu_info)
# ---------------------------------------------------------------------------
def _ceil_to(v, m):
    return ((v + m - 1) // m) * m


def _default_vmem_budget():
    cap = 64 * 1024 * 1024                      # conservative fallback (v7x-sized)
    try:
        info = pltpu.get_tpu_info()
        cap = int(getattr(info, "vmem_capacity_bytes", cap))
    except Exception:
        pass
    return int(cap * 0.6)                       # leave headroom below physical VMEM


def _choose_batch_block(B, T_pad, KE_pad, N_pad, O_pad, vmem_budget):
    """Largest batch tile (multiple of 8, divides B) whose live set fits the VMEM
    budget, preferring grid >= 4 (DMA pipelining + v7x dual-core sharding), then >= 2."""
    def live_bytes(tb):
        return (2 * tb * T_pad * KE_pad * 2     # double-buffered patches tile (bf16)
                + 2 * tb * T_pad * N_pad * 4    # f32 conv temp (+ masked copy headroom)
                + 2 * tb * O_pad * 4            # double-buffered output (f32)
                + KE_pad * N_pad * 2            # stacked conv weights (bf16)
                + N_pad * O_pad * 2             # fc1 weight (bf16)
                + T_pad * N_pad * 4             # validity mask (f32)
                + (N_pad + O_pad) * 4)          # biases

    cands = sorted({tb for tb in range(8, B + 1, 8) if B % tb == 0} | {B})
    fitting = [tb for tb in cands if live_bytes(tb) <= vmem_budget] or [cands[0]]
    for min_grid in (4, 2, 1):
        ok = [tb for tb in fitting if B // tb >= min_grid]
        if ok:
            return max(ok)
    return fitting[0]


# ---------------------------------------------------------------------------
# Wrapper: lane-dense im2col in JAX, one pallas_call, slice padded class lanes off
# ---------------------------------------------------------------------------
def cnn_classifier_forward(x_nchw, packed, *, batch_block=None, vmem_budget_bytes=None):
    """x_nchw: (B, 1, L, E) float32 (NCHW, single input channel)."""
    wc, bc = packed["wc"], packed["bc"]
    mask, wf, bf = packed["mask"], packed["wf"], packed["bf"]
    Kmin, Kmax = packed["k_min"], packed["k_max"]
    O = packed["output_size"]

    B, _, L, E = x_nchw.shape
    assert L == packed["seq_len"], "packed params were built for a different seq_len"
    T = L - Kmin + 1
    T_pad = packed["t_pad"]
    KE = Kmax * E
    KE_pad = packed["ke_pad"]
    L_src = T + Kmax - 1                                   # padded source length for im2col

    # Wrapper-side im2col -> lane-dense (B, T_pad, KE_pad) bf16 patches operand.
    x = x_nchw[:, 0, :, :]
    x = jnp.pad(x, ((0, 0), (0, L_src - L), (0, 0)))
    patches = jnp.concatenate([x[:, k:k + T, :] for k in range(Kmax)], axis=-1)  # (B,T,KE)
    patches = jnp.pad(patches, ((0, 0), (0, T_pad - T), (0, KE_pad - KE)))
    patches = patches.astype(jnp.bfloat16)

    N_pad = wc.shape[1]
    O_pad = wf.shape[1]

    budget = int(vmem_budget_bytes) if vmem_budget_bytes else _default_vmem_budget()
    TB = batch_block if batch_block is not None else _choose_batch_block(
        B, T_pad, KE_pad, N_pad, O_pad, budget)
    assert B % TB == 0, "batch_block must divide the batch size"
    assert TB % 8 == 0 or TB == B, "batch_block must be a multiple of 8 (or the full batch)"
    grid = (B // TB,)

    out = pl.pallas_call(
        fused_cnn_kernel,
        out_shape=jax.ShapeDtypeStruct((B, O_pad), jnp.float32),
        grid_spec=pltpu.PrefetchScalarGridSpec(
            num_scalar_prefetch=0,
            grid=grid,
            in_specs=[
                pl.BlockSpec((TB, T_pad, KE_pad), lambda i: (i, 0, 0)),  # patches tile
                pl.BlockSpec((KE_pad, N_pad), lambda i: (0, 0)),         # stacked conv weights
                pl.BlockSpec((1, N_pad), lambda i: (0, 0)),              # conv biases
                pl.BlockSpec((T_pad, N_pad), lambda i: (0, 0)),          # position-validity mask
                pl.BlockSpec((N_pad, O_pad), lambda i: (0, 0)),          # fc1 weight
                pl.BlockSpec((1, O_pad), lambda i: (0, 0)),              # fc1 bias (+ -inf pad)
            ],
            out_specs=pl.BlockSpec((TB, O_pad), lambda i: (i, 0)),
        ),
        compiler_params=pltpu.CompilerParams(
            dimension_semantics=("parallel",),   # batch grid: pipelined + sharded on v7x
            vmem_limit_bytes=budget,
        ),
    )(patches, wc, bc, mask, wf, bf)
    return out[:, :O]


# ---------------------------------------------------------------------------
# Parameter init (mirrors weights_init: uniform(+-sqrt(6/(fan_in+fan_out))), bias=0)
# ---------------------------------------------------------------------------
def init_params(key, kernel_sizes, kernel_dim, embedding_dim, output_size):
    convs = []
    for K in kernel_sizes:
        key, sub = jax.random.split(key)
        fan_in = 1 * K * embedding_dim
        fan_out = K * embedding_dim * kernel_dim
        bound = float(np.sqrt(6.0 / (fan_in + fan_out)))
        w = jax.random.uniform(sub, (kernel_dim, 1, K, embedding_dim),
                               jnp.float32, -bound, bound)            # torch layout (C,1,K,E)
        b = jnp.zeros((kernel_dim,), jnp.float32)
        convs.append((w, b))
    in_f = len(kernel_sizes) * kernel_dim
    key, sub = jax.random.split(key)
    bound = float(np.sqrt(6.0 / (in_f + output_size)))
    fc1_w = jax.random.uniform(sub, (output_size, in_f), jnp.float32, -bound, bound)
    fc1_b = jnp.zeros((output_size,), jnp.float32)
    return {"convs": convs, "fc1_w": fc1_w, "fc1_b": fc1_b,
            "kernel_sizes": tuple(kernel_sizes), "kernel_dim": kernel_dim,
            "embedding_dim": embedding_dim, "output_size": output_size}


def pack_params(params, seq_len):
    """Pack per-conv / fc weights into the lane-padded, tap-stacked kernel operands."""
    ks = params["kernel_sizes"]
    C = params["kernel_dim"]
    E = params["embedding_dim"]
    O = params["output_size"]
    L = seq_len
    Kmin, Kmax = min(ks), max(ks)
    assert L >= Kmax, (
        f"seq_len={L} must be >= max kernel size {Kmax} (PyTorch Conv2d would error)")
    T = L - Kmin + 1
    T_pad = _ceil_to(T, 8)
    KE = Kmax * E
    KE_pad = _ceil_to(KE, LANE)
    n_feat = len(ks) * C
    N_pad = _ceil_to(max(n_feat, 1), LANE)
    O_pad = _ceil_to(max(O, 1), LANE)

    wc = np.zeros((KE_pad, N_pad), np.float32)
    bc = np.zeros((1, N_pad), np.float32)
    mask = np.zeros((T_pad, N_pad), np.float32)
    for i, (K, (w, b)) in enumerate(zip(ks, params["convs"])):
        # torch (C,1,K,E) -> (K,E,C) so patch column k*E+e hits weight [c,0,k,e]
        w_kec = np.transpose(np.asarray(w)[:, 0, :, :], (1, 2, 0))
        wc[:K * E, i * C:(i + 1) * C] = w_kec.reshape(K * E, C)
        bc[0, i * C:(i + 1) * C] = np.asarray(b)
        mask[:L - K + 1, i * C:(i + 1) * C] = 1.0        # positions t <= L-K are valid

    wf = np.zeros((N_pad, O_pad), np.float32)
    wf[:n_feat, :O] = np.asarray(params["fc1_w"]).T       # (F,O)
    bf = np.full((1, O_pad), NEG_BIG, np.float32)         # padded logits -> -inf
    bf[0, :O] = np.asarray(params["fc1_b"])

    return {"wc": jnp.asarray(wc, jnp.bfloat16),
            "bc": jnp.asarray(bc),
            "mask": jnp.asarray(mask),
            "wf": jnp.asarray(wf, jnp.bfloat16),
            "bf": jnp.asarray(bf),
            "k_min": Kmin, "k_max": Kmax,
            "t_pad": T_pad, "ke_pad": KE_pad,
            "seq_len": L, "output_size": O}


# ---------------------------------------------------------------------------
# Pure-JAX references for correctness checking
# ---------------------------------------------------------------------------
def reference_forward(x_nchw, params, *, emulate_bf16=False):
    def rnd(a):  # optionally mimic the kernel's bf16 storage of x / weights / pooled
        return a.astype(jnp.bfloat16).astype(jnp.float32) if emulate_bf16 else a

    x = rnd(x_nchw[:, 0, :, :])                                      # (B, L, E)
    pooled = []
    for K, (w, b) in zip(params["kernel_sizes"], params["convs"]):
        w_kec = rnd(jnp.transpose(w[:, 0, :, :], (1, 2, 0)))          # (K, E, C)
        Lout = x.shape[1] - K + 1
        s = sum(jnp.einsum("ble,ec->blc", x[:, k:k + Lout, :], w_kec[k])
                for k in range(K))
        s = jnp.maximum(s + b[None, None, :], 0.0)
        pooled.append(jnp.max(s, axis=1))
    cat = jnp.concatenate(pooled, axis=1)                             # (B, 3C)
    logits = rnd(cat) @ rnd(params["fc1_w"].T) + params["fc1_b"]
    return jax.nn.log_softmax(logits, axis=1)


if __name__ == "__main__":
    kernel_sizes = (3, 4, 5)
    kernel_dim = 8
    embedding_dim = 16
    output_size = 4
    L = 12

    key = jax.random.PRNGKey(0)
    kparam, kx1, kx2 = jax.random.split(key, 3)
    params = init_params(kparam, kernel_sizes, kernel_dim, embedding_dim, output_size)
    packed = pack_params(params, seq_len=L)

    # Case 1: B=32 with the auto-chosen batch tile (TB=8 -> grid=4: pipelined / sharded).
    xb = jax.random.normal(kx1, (32, 1, L, embedding_dim), jnp.float32)
    out_b = jax.block_until_ready(cnn_classifier_forward(xb, packed))
    assert out_b.shape == (32, output_size)
    np.testing.assert_allclose(np.asarray(out_b),
                               np.asarray(reference_forward(xb, params, emulate_bf16=True)),
                               rtol=1e-3, atol=1e-3)
    np.testing.assert_allclose(np.asarray(out_b),
                               np.asarray(reference_forward(xb, params, emulate_bf16=False)),
                               rtol=5e-2, atol=5e-2)

    # Case 2: tiny B=2 (whole-batch tile, grid=1 path).
    xs = jax.random.normal(kx2, (2, 1, L, embedding_dim), jnp.float32)
    out_s = jax.block_until_ready(cnn_classifier_forward(xs, packed))
    assert out_s.shape == (2, output_size)
    np.testing.assert_allclose(np.asarray(out_s),
                               np.asarray(reference_forward(xs, params, emulate_bf16=True)),
                               rtol=1e-3, atol=1e-3)
    np.testing.assert_allclose(np.asarray(out_s),
                               np.asarray(reference_forward(xs, params, emulate_bf16=False)),
                               rtol=5e-2, atol=5e-2)

    print("KERNEL_OK")
</pallas_src>

<mosaic_0001>
module attributes {stable_mosaic.version = 11 : i64} {
  func.func @fused_cnn_kernel(%arg0: i32, %arg1: memref<8x16x128xbf16, #tpu.memory_space<vmem>>, %arg2: memref<128x128xbf16, #tpu.memory_space<vmem>>, %arg3: memref<1x128xf32, #tpu.memory_space<vmem>>, %arg4: memref<16x128xf32, #tpu.memory_space<vmem>>, %arg5: memref<128x128xbf16, #tpu.memory_space<vmem>>, %arg6: memref<1x128xf32, #tpu.memory_space<vmem>>, %arg7: memref<8x128xf32, #tpu.memory_space<vmem>>) attributes {dimension_semantics = [#tpu.dimension_semantics<parallel>], iteration_bounds = array<i64: 4>, scalar_prefetch = 0 : i64, scratch_operands = 0 : i64, tpu.core_type = #tpu.core_type<tc>, window_params = [{transform_indices = @transform_0, window_bounds = array<i64: 8, 16, 128>}, {pipeline_mode = #tpu.pipeline_mode<synchronous>, transform_indices = @transform_1, window_bounds = array<i64: 128, 128>}, {pipeline_mode = #tpu.pipeline_mode<synchronous>, transform_indices = @transform_2, window_bounds = array<i64: 1, 128>}, {pipeline_mode = #tpu.pipeline_mode<synchronous>, transform_indices = @transform_3, window_bounds = array<i64: 16, 128>}, {pipeline_mode = #tpu.pipeline_mode<synchronous>, transform_indices = @transform_4, window_bounds = array<i64: 128, 128>}, {pipeline_mode = #tpu.pipeline_mode<synchronous>, transform_indices = @transform_5, window_bounds = array<i64: 1, 128>}, {transform_indices = @transform_6, window_bounds = array<i64: 8, 128>}]} {
    %c0 = arith.constant 0 : index
    %c0_0 = arith.constant 0 : index
    %c0_1 = arith.constant 0 : index
    %0 = vector.load %arg1[%c0, %c0_0, %c0_1] : memref<8x16x128xbf16, #tpu.memory_space<vmem>>, vector<8x16x128xbf16>
    %1 = vector.shape_cast %0 : vector<8x16x128xbf16> to vector<128x128xbf16>
    %c0_2 = arith.constant 0 : index
    %c0_3 = arith.constant 0 : index
    %2 = vector.load %arg2[%c0_2, %c0_3] : memref<128x128xbf16, #tpu.memory_space<vmem>>, vector<128x128xbf16>
    %cst = arith.constant dense<0.000000e+00> : vector<128x128xf32>
    %3 = tpu.matmul %1, %2, %cst {dimension_numbers = #tpu.dot_dimension_numbers<[1], [0], [0], [1], [0, 0, 1, 1], [], []>} : vector<128x128xbf16>, vector<128x128xbf16>, vector<128x128xf32> -> vector<128x128xf32>
    %c0_4 = arith.constant 0 : index
    %c0_5 = arith.constant 0 : index
    %4 = vector.load %arg3[%c0_4, %c0_5] : memref<1x128xf32, #tpu.memory_space<vmem>>, vector<1x128xf32>
    %5 = vector.broadcast %4 : vector<1x128xf32> to vector<128x128xf32>
    %6 = arith.addf %3, %5 : vector<128x128xf32>
    %cst_6 = arith.constant 0.000000e+00 : f32
    %7 = vector.broadcast %cst_6 : f32 to vector<128x128xf32>
    %8 = arith.maximumf %6, %7 : vector<128x128xf32>
    %9 = vector.shape_cast %8 : vector<128x128xf32> to vector<8x16x128xf32>
    %c0_7 = arith.constant 0 : index
    %c0_8 = arith.constant 0 : index
    %10 = vector.load %arg4[%c0_7, %c0_8] : memref<16x128xf32, #tpu.memory_space<vmem>>, vector<16x128xf32>
    %cst_9 = arith.constant 0.000000e+00 : f32
    %11 = vector.broadcast %cst_9 : f32 to vector<16x128xf32>
    %12 = arith.cmpf ogt, %10, %11 : vector<16x128xf32>
    %cst_10 = arith.constant 0.000000e+00 : f32
    %13 = vector.shape_cast %12 : vector<16x128xi1> to vector<1x16x128xi1>
    %14 = vector.broadcast %13 : vector<1x16x128xi1> to vector<8x16x128xi1>
    %15 = vector.broadcast %cst_10 : f32 to vector<8x16x128xf32>
    %16 = arith.select %14, %9, %15 : vector<8x16x128xi1>, vector<8x16x128xf32>
    %cst_11 = arith.constant dense<0xFF800000> : vector<8x128xf32>
    %17 = vector.multi_reduction <maximumf>, %16, %cst_11 [1] : vector<8x16x128xf32> to vector<8x128xf32>
    %18 = arith.truncf %17 : vector<8x128xf32> to vector<8x128xbf16>
    %c0_12 = arith.constant 0 : index
    %c0_13 = arith.constant 0 : index
    %19 = vector.load %arg5[%c0_12, %c0_13] : memref<128x128xbf16, #tpu.memory_space<vmem>>, vector<128x128xbf16>
    %cst_14 = arith.constant dense<0.000000e+00> : vector<8x128xf32>
    %20 = tpu.matmul %18, %19, %cst_14 {dimension_numbers = #tpu.dot_dimension_numbers<[1], [0], [0], [1], [0, 0, 1, 1], [], []>} : vector<8x128xbf16>, vector<128x128xbf16>, vector<8x128xf32> -> vector<8x128xf32>
    %c0_15 = arith.constant 0 : index
    %c0_16 = arith.constant 0 : index
    %21 = vector.load %arg6[%c0_15, %c0_16] : memref<1x128xf32, #tpu.memory_space<vmem>>, vector<1x128xf32>
    %22 = vector.broadcast %21 : vector<1x128xf32> to vector<8x128xf32>
    %23 = arith.addf %20, %22 : vector<8x128xf32>
    %cst_17 = arith.constant dense<0xFF800000> : vector<8xf32>
    %24 = vector.multi_reduction <maximumf>, %23, %cst_17 [1] : vector<8x128xf32> to vector<8xf32>
    %25 = vector.shape_cast %24 : vector<8xf32> to vector<8x1xf32>
    %26 = vector.broadcast %25 : vector<8x1xf32> to vector<8x128xf32>
    %27 = arith.subf %23, %26 : vector<8x128xf32>
    %28 = math.exp %27 : vector<8x128xf32>
    %cst_18 = arith.constant dense<0.000000e+00> : vector<8xf32>
    %29 = vector.multi_reduction <add>, %28, %cst_18 [1] : vector<8x128xf32> to vector<8xf32>
    %30 = vector.shape_cast %29 : vector<8xf32> to vector<8x1xf32>
    %31 = math.log %30 : vector<8x1xf32>
    %32 = vector.broadcast %31 : vector<8x1xf32> to vector<8x128xf32>
    %33 = arith.subf %27, %32 : vector<8x128xf32>
    %c0_19 = arith.constant 0 : index
    %c0_20 = arith.constant 0 : index
    %34 = vector.load %arg7[%c0_19, %c0_20] : memref<8x128xf32, #tpu.memory_space<vmem>>, vector<8x128xf32>
    tpu.vector_store %arg7[%c0_19, %c0_20], %33 {strides = array<i32>} : memref<8x128xf32, #tpu.memory_space<vmem>>, vector<8x128xf32>,
    return
  }
  func.func @transform_0(%arg0: i32) -> (i32, i32, i32) {
    %c0_i32 = arith.constant 0 : i32
    %c0_i32_0 = arith.constant 0 : i32
    %c0_i32_1 = arith.constant 0 : i32
    return %arg0, %c0_i32, %c0_i32_0 : i32, i32, i32
  }
  func.func @transform_1(%arg0: i32) -> (i32, i32) {
    %c0_i32 = arith.constant 0 : i32
    %c0_i32_0 = arith.constant 0 : i32
    %c0_i32_1 = arith.constant 0 : i32
    return %c0_i32, %c0_i32_0 : i32, i32
  }
  func.func @transform_2(%arg0: i32) -> (i32, i32) {
    %c0_i32 = arith.constant 0 : i32
    %c0_i32_0 = arith.constant 0 : i32
    %c0_i32_1 = arith.constant 0 : i32
    return %c0_i32, %c0_i32_0 : i32, i32
  }
  func.func @transform_3(%arg0: i32) -> (i32, i32) {
    %c0_i32 = arith.constant 0 : i32
    %c0_i32_0 = arith.constant 0 : i32
    %c0_i32_1 = arith.constant 0 : i32
    return %c0_i32, %c0_i32_0 : i32, i32
  }
  func.func @transform_4(%arg0: i32) -> (i32, i32) {
    %c0_i32 = arith.constant 0 : i32
    %c0_i32_0 = arith.constant 0 : i32
    %c0_i32_1 = arith.constant 0 : i32
    return %c0_i32, %c0_i32_0 : i32, i32
  }
  func.func @transform_5(%arg0: i32) -> (i32, i32) {
    %c0_i32 = arith.constant 0 : i32
    %c0_i32_0 = arith.constant 0 : i32
    %c0_i32_1 = arith.constant 0 : i32
    return %c0_i32, %c0_i32_0 : i32, i32
  }
  func.func @transform_6(%arg0: i32) -> (i32, i32) {
    %c0_i32 = arith.constant 0 : i32
    %c0_i32_0 = arith.constant 0 : i32
    return %arg0, %c0_i32 : i32, i32
  }
}

</mosaic_0001>

<bundles_post_ra>
// kernel: tpu_custom_call.1
= control target key start
LH: loop header
LB: loop body
LE: loop exit
PB: predicated region body
PF: predicated region fallthrough
CT: control target
= control target key end

     0   :  { %11 = vsyncpa [#allocation3], 0  ;;  %s1569_s0 = inlined_call_operand.hbm [shape: bf16[32,16,128], index: 0, kind: input, shape index: {}]   ;;  %s1570_s1 = inlined_call_operand.hbm [shape: bf16[128,128], index: 1, kind: input, shape index: {}]   ;;  %s1571_s2 = inlined_call_operand.vmem [shape: f32[1,128], index: 2, kind: input, shape index: {}]   ;;  %s1572_s3 = inlined_call_operand.hbm [shape: f32[16,128], index: 3, kind: input, shape index: {}]   ;;  %s1573_s4 = inlined_call_operand.hbm [shape: bf16[128,128], index: 4, kind: input, shape index: {}]   ;;  %s1574_s5 = inlined_call_operand.vmem [shape: f32[1,128], index: 5, kind: input, shape index: {}]   ;;  %s1575_s6 = inlined_call_operand.hbm [shape: f32[32,128], index: 6, kind: output, shape index: {}]  }
   0x1   :  { %13 = vsyncpa [#allocation3 + $0x1], 0 }
   0x2   :  { %14 = vsyncpa [#allocation6], 0 }
   0x3   :  { %15 = vsyncpa [#allocation9], 0 }
   0x4   :  { %16 = vsyncpa [#allocation4], 0 }
   0x5   :  { %18 = vsyncpa [#allocation4 + $0x1], 0  ;;  %s1331_s21 = smov 0   ;;  %s1333_s22 = smov 0  }
   0x6   :  { %s1335_s23 = smov 0   ;;  %s1337_s24 = smov 0  }
   0x7 LB: > { %s1352_s25 = sadd.s32 4294967295, %s1287_s24   ;;  %s848_s26 = sadd.s32 4294967294, %s1287_s24   ;;  %s1287_s24 = sphi %s1337_s24, %s1589_s24   ;;  %s1283_s23 = sphi %s1335_s23, %s1588_s23   ;;  %s1279_s22 = sphi %s1333_s22, %s1587_s22   ;;  %s1275_s21 = sphi %s1331_s21, %s1586_s21  }
   0x8   : > { %p44_p0 = scmp.ne.s32.totalorder %s1279_s22, %s1275_s21  ;;  %p45_p1 = scmp.eq.s32.totalorder %s1352_s25, 0 }
   0x9   : > { %p173_p2 = scmp.eq.s32.totalorder %s1352_s25, 3  ;;  %p179_p3 = scmp.eq.s32.totalorder %s848_s26, 3 }
   0xa   : > { %p1361_p4 = por %p45_p1, %p44_p0  ;;  %p849_p5 = scmp.ge.s32.totalorder %s1287_s24, 1 }
   0xb   : > { %p1366_p6 = por %p179_p3, %p44_p0  ;;  %p186_p7 = scmp.lt.s32.totalorder %s1287_s24, 5 }
   0xc   : > { %s197_s7 = sshll.u32 %s1570_s1, 4  ;;  %s1289_s9 = smov [#allocation5]   ;;  %s198_s7 = int_to_ptr.hbm [resolvable:$true] %s197_s7 }
   0xd   : > { %p1374_p8 = pnand %p849_p5, %p186_p7  ;;  %s199_s10 = sshll.u32 %s1289_s9, 4  ;;  %s200_s10 = int_to_ptr.vmem [resolvable:$true] %s199_s10 }
   0xe   : > { %s214_s14 = sshll.u32 %s1572_s3, 4  ;;  %s1576_s15 = smov 64   ;;  %s215_s14 = int_to_ptr.hbm [resolvable:$true] %s214_s14 }
   0xf   : > { %p1022_p9 = pneg %p1374_p8  ;;  %s1577_s16 = smov 4  }
  0x10   : > { %s1292_s17 = smov [#allocation7]   ;;  %s1293_s19 = smov 128  }
  0x11   : > { %p1382_p10 = pnand %p1022_p9, %p45_p1  ;;  %s216_s18 = sshll.u32 %s1292_s17, 4  ;;  %s217_s18 = int_to_ptr.vmem [resolvable:$true] %s216_s18 }
  0x12   : > { %s1294_s20 = smov 8   ;;  %s228_s30 = sshll.u32 %s1573_s4, 4  ;;  %s229_s30 = int_to_ptr.hbm [resolvable:$true] %s228_s30 }
  0x13   : > { %1025 = dma.hbm_to_vmem [thread:$0]  (!%p1382_p10), %s198_s7, 1024, %s200_s10, [#allocation6], %s1576_s15, %s1576_s15, %s1577_s16  }
  0x14   : > { %1028 = dma.hbm_to_vmem [thread:$0]  (!%p1382_p10), %s215_s14, 256, %s217_s18, [#allocation6], %s1293_s19, %s1293_s19, %s1294_s20  }
  0x15   : > { %s1295_s7 = smov [#allocation8]   ;;  %s1405_s10 = sadd.s32 1, %s1287_s24  }
  0x16   : > { %s230_s9 = sshll.u32 %s1295_s7, 4  ;;  %s28_s12 = ssub.s32 %s1287_s24, %s1405_s10  ;;  %s231_s9 = int_to_ptr.vmem [resolvable:$true] %s230_s9 }
  0x17   : > { %1031 = dma.hbm_to_vmem [thread:$0]  (!%p1382_p10), %s229_s30, 1024, %s231_s9, [#allocation9], %s1576_s15, %s1576_s15, %s1577_s16  }
  0x18   : > { %s31_s13 = sadd.s32 1, %s1283_s23  ;;  %p29_p11 = scmp.eq.s32.totalorder %s28_s12, 0 }
  0x19   : > { %p38_p12 = scmp.ne.s32.totalorder %s1283_s23, %s1279_s22  ;;  %p39_p13 = scmp.eq.s32.totalorder %s1287_s24, 0 }
  0x1a   : > { %s1414_s14 = scalar_select %p29_p11, %s1283_s23, %s31_s13  }
  0x1b   : > { %p1418_p0 = por %p173_p2, %p38_p12  ;;  %p1043_p3 = scmp.lt.s32.totalorder %s1287_s24, 4 }
  0x1c   : > { %s247_s11 = sand.u32 1, %s1283_s23   ;;  %s965_s18 = sshll.u32 %s1287_s24, 6 }
  0x1d   : > { %p40_p5 = por %p39_p13, %p38_p12  ;;  %s854_s19 = sshll.u32 %s247_s11, 6 }
  0x1e   : > { %s257_s29 = scalar_lea.hbm %s1569_s0, %s965_s18  ;;  %s251_s7 = scalar_lea.vmem [#allocation2], %s854_s19 }
  0x1f   : > { %s258_s30 = sshll.u32 %s257_s29, 4  ;;  %s260_s9 = sshll.u32 %s251_s7, 4  ;;  %s259_s30 = int_to_ptr.hbm [resolvable:$true] %s258_s30  ;;  %s261_s9 = int_to_ptr.vmem [resolvable:$true] %s260_s9 }
  0x20   : > { %p1428_p7 = pnand %p1043_p3, %p40_p5  ;;  %s248_s13 = scalar_lea.sflag [#allocation3], %s247_s11 }
  0x21   : > { %s1183_s15 = sshra.s32 %s259_s30, 4  ;;  %s1190_s19 = scalar_lea.hbm %s1569_s0, 256  ;;  %s1184_s15 = int_to_ptr.hbm [resolvable:$true] %s1183_s15 }
  0x22   : > { %s1185_s16 = scalar_lea.hbm %s1184_s15, 64  ;;  %p1187_p9 = pneg %p1428_p7 }
  0x23   : > { %p1186_p2 = scmp.ne.s32.totalorder %s1184_s15, %s1185_s16  ;;  %p1191_p12 = scmp.lt.s32.totalorder %s1184_s15, %s1569_s0 }
  0x24   : > { %p1192_p13 = scmp.lt.s32.totalorder %s1190_s19, %s1185_s16 }
  0x25   : > { %p1188_p10 = pnand %p1187_p9, %p1186_p2 }
  0x26   : > { %p1193_p3 = por %p1192_p13, %p1191_p12 }
  0x27   : > { %p1189_p11 = pneg %p1188_p10 }
  0x29   : > { %p1194_p5 = pnand %p1193_p3, %p1189_p11 }
  0x2b   : > { %1197 = shalt.err (!%p1194_p5)
}
  0x2c   : > { %s1584_s11 = smov 4   ;;  %s1585_s7 = smov 64  }
  0x2d   : > { %1035 = dma.hbm_to_vmem [thread:$0]  (!%p1428_p7), %s259_s30, 1024, %s261_s9, %s248_s13, %s1585_s7, %s1585_s7, %s1584_s11  }
  0x2e   : > { %272 = sbr.rel (%p1374_p8) target bundleno = 674 (0x2a2), region = 44  ;;  %s1448_s18 = sand.u32 (!%p1374_p8), 1, %s1279_s22  }
  0x2f   : > { %s859_s15 = sshll.u32 (!%p1374_p8), %s1448_s18, 6  ;;  %s275_s16 = scalar_lea.sflag (!%p1374_p8), [#allocation3], %s1448_s18 }
  0x30   : > { %s1452_s20 = scalar_lea.vmem (!%p1374_p8), [#allocation2], %s859_s15 }
  0x33   : > { %1258 = dma.done.wait (%p1361_p4), %s275_s16, 1024  }
  0x34   : > { %1260 = vsyncadd (%p1361_p4), %s275_s16, 4294966272 }
  0x35   : > { %1262 = dma.done.wait (%p45_p1), [#allocation6], 1280  }
  0x36   : > { %1264 = vsyncadd (%p45_p1), [#allocation6], 4294966016 }
  0x37   : > { %1266 = dma.done.wait (%p45_p1), [#allocation9], 1024  }
  0x38   : > { %1268 = vsyncadd (%p45_p1), [#allocation9], 4294966272  ;;  %v981_v0 = vld [vmem:[#allocation5 + $0x38] sm:$0xff]  ;;  %v980_v1 = vld [vmem:[#allocation5 + $0x30] sm:$0xff]  ;;  %vm645_vm2 = vcmask 1041409   ;;  %vm647_vm3 = vcmask 1042434  }
  0x39   : > { %456 = vmatpush.bf16.msra.mxu0 %v981_v0  ;;  %990 = vmatpush.bf16.msra.mxu2 %v981_v0  ;;  %v979_v2 = vld [vmem:[#allocation5 + $0x28] sm:$0xff]  ;;  %v978_v3 = vld [vmem:[#allocation5 + $0x20] sm:$0xff]  ;;  %v977_v4 = vld [vmem:[#allocation5 + $0x18] sm:$0xff]  ;;  %vm649_vm4 = vcmask 1043459   ;;  %vm651_vm5 = vcmask 1044484   ;;  %vm653_vm6 = vcmask 1045509  }
  0x3a   : > { %991 = vmatpush.bf16.msra.mxu3 %v981_v0  ;;  %v976_v5 = vld [vmem:[#allocation5 + $0x10] sm:$0xff]  ;;  %v975_v6 = vld [vmem:[#allocation5 + $0x8] sm:$0xff]  ;;  %v974_v7 = vld [vmem:[#allocation5] sm:$0xff]  ;;  %vm655_vm7 = vcmask 1046534   ;;  %vm657_vm8 = vcmask 1047559   ;;  %s863_s12 = sshll.u32 %s1448_s18, 3 }
  0x3b   : > { %v966_v8 = vld [vmem:[%s1452_s20] sm:$0xff]  ;;  %v968_v9 = vld [vmem:[%s1452_s20 + $0x10] sm:$0xff]  ;;  %v971_v10 = vld [vmem:[%s1452_s20 + $0x28] sm:$0xff]  ;;  %s961_s13 = sshll.u32 %s1352_s25, 3  ;;  %s322_s11 = scalar_lea.vmem [#allocation10], %s863_s12 }
  0x3c   : > { %v967_v11 = vld [vmem:[%s1452_s20 + $0x8] sm:$0xff]  ;;  %v969_v12 = vld [vmem:[%s1452_s20 + $0x18] sm:$0xff]  ;;  %v972_v13 = vld [vmem:[%s1452_s20 + $0x30] sm:$0xff]  ;;  %s744_s29 = scalar_lea.hbm %s1575_s6, %s961_s13  ;;  %s746_s7 = sshll.u32 %s322_s11, 4  ;;  %s747_s7 = int_to_ptr.vmem [resolvable:$true] %s746_s7 }
  0x3d   : > { %457 = vmatpush.bf16.msra.mxu0 %v980_v1  ;;  %992 = vmatpush.bf16.msra.mxu2 %v980_v1  ;;  %v970_v14 = vld [vmem:[%s1452_s20 + $0x20] sm:$0xff]  ;;  %v973_v15 = vld [vmem:[%s1452_s20 + $0x38] sm:$0xff]  ;;  %v989_v20 = vld [vmem:[#allocation8 + $0x38] sm:$0xff]  ;;  %s748_s15 = sshll.u32 %s744_s29, 4  ;;  %s734_s16 = scalar_lea.sflag [#allocation4], %s1448_s18  ;;  %s749_s15 = int_to_ptr.hbm [resolvable:$true] %s748_s15 }
  0x3e   : > { %993 = vmatpush.bf16.msra.mxu3 %v980_v1  ;;  %709 = vmatpush.bf16.msra.mxu1 %v989_v20  ;;  %v988_v24 = vld [vmem:[#allocation8 + $0x30] sm:$0xff]  ;;  %v987_v29 = vld [vmem:[#allocation8 + $0x28] sm:$0xff]  ;;  %v1482_v30 = vld [vmem:[#allocation7 + $0x8] sm:$0xff]  ;;  %s1227_s20 = sshra.s32 %s749_s15, 4  ;;  %s1233_s30 = scalar_lea.hbm %s1575_s6, 32  ;;  %s1228_s20 = int_to_ptr.hbm [resolvable:$true] %s1227_s20 }
  0x3f   : > { %v1477_v25 = vld [vmem:[%s1571_s2] ss:$0 sm:$0xff]  ;;  %v986_v39 = vld [vmem:[#allocation8 + $0x20] sm:$0xff]  ;;  %vm524_vm0 = vcmp.gt.f32.partialorder %v1482_v30, 0.0  ;;  %v985_v50 = vld [vmem:[#allocation8 + $0x18] sm:$0xff]  ;;  %s1229_s27 = scalar_lea.hbm %s1228_s20, 8  ;;  %p1234_p7 = scmp.lt.s32.totalorder %s1228_s20, %s1575_s6 }
  0x40   : > { %v1484_v32 = vld [vmem:[#allocation7] sm:$0xff]  ;;  %p1230_p1 = scmp.ne.s32.totalorder %s1228_s20, %s1229_s27  ;;  %p1235_p2 = scmp.lt.s32.totalorder %s1233_s30, %s1229_s27 }
  0x41   : > { %458 = vmatpush.bf16.msra.mxu0 %v979_v2  ;;  %994 = vmatpush.bf16.msra.mxu2 %v979_v2  ;;  %vm523_vm1 = vcmp.gt.f32.partialorder %v1484_v32, 0.0  ;;  %v984_v0 = vld [vmem:[#allocation8 + $0x10] sm:$0xff] }
  0x42   : > { %995 = vmatpush.bf16.msra.mxu3 %v979_v2  ;;  %710 = vmatpush.bf16.msra.mxu1 %v988_v24  ;;  %p1231_p4 = pnand %p1230_p1, %p1418_p0  ;;  %p1236_p9 = por %p1235_p2, %p1234_p7 }
  0x44   : > { %p1232_p8 = pneg %p1231_p4 }
  0x45   : > { %459 = vmatpush.bf16.msra.mxu0 %v978_v3  ;;  %996 = vmatpush.bf16.msra.mxu2 %v978_v3 }
  0x46   : > { %997 = vmatpush.bf16.msra.mxu3 %v978_v3  ;;  %711 = vmatpush.bf16.msra.mxu1 %v987_v29  ;;  %p1237_p10 = pnand %p1236_p9, %p1232_p8 }
  0x49   : > { %460 = vmatpush.bf16.msra.mxu0 %v977_v4  ;;  %998 = vmatpush.bf16.msra.mxu2 %v977_v4 }
  0x4a   : > { %999 = vmatpush.bf16.msra.mxu3 %v977_v4  ;;  %712 = vmatpush.bf16.msra.mxu1 %v986_v39 }
  0x4d   : > { %461 = vmatpush.bf16.msra.mxu0 %v976_v5  ;;  %1000 = vmatpush.bf16.msra.mxu2 %v976_v5 }
  0x4e   : > { %1001 = vmatpush.bf16.msra.mxu3 %v976_v5  ;;  %713 = vmatpush.bf16.msra.mxu1 %v985_v50 }
  0x51   : > { %462 = vmatpush.bf16.msra.mxu0 %v975_v6  ;;  %1002 = vmatpush.bf16.msra.mxu2 %v975_v6 }
  0x52   : > { %1003 = vmatpush.bf16.msra.mxu3 %v975_v6  ;;  %714 = vmatpush.bf16.msra.mxu1 %v984_v0 }
  0x55   : > { %463 = vmatpush.bf16.msra.mxu0 %v974_v7  ;;  %1004 = vmatpush.bf16.msra.mxu2 %v974_v7 }
  0x56   : > { %1005 = vmatpush.bf16.msra.mxu3 %v974_v7 }
  0x58   : > { %464 = vmatmul.bf16.vlgmr.msra.gmra.mxu0 %v966_v8  ;;  %474 = vmatmul.bf16.vlgmr.msra.gmra.mxu2 %v968_v9 }
  0x59   : > { %489 = vmatmul.bf16.vlgmr.msra.gmra.mxu3 %v971_v10 }
  0x68   : > { %469 = vmatmul.bf16.gmra.mxu0 %v967_v11  ;;  %479 = vmatmul.bf16.gmra.mxu2 %v969_v12 }
  0x69   : > { %494 = vmatmul.bf16.gmra.mxu3 %v972_v13 }
  0x78   : > { %484 = vmatmul.bf16.gmra.mxu2 %v970_v14  ;;  %v983_v14 = vld [vmem:[#allocation8 + $0x8] sm:$0xff] }
  0x79   : > { %499 = vmatmul.bf16.gmra.mxu3 %v973_v15  ;;  %715 = vmatpush.bf16.msra.mxu1 %v983_v14 }
  0xd5   : > { %v465_v16 = vpop.f32.mrf.mxu0 }
  0xd6   : > { %v466_v27 = vadd.f32 %v1477_v25, %v465_v16 }
  0xd8   : > { %v505_v36 = vmax.f32 %v466_v27, 0.0 }
  0xda   : > { %v529_v47 = vsel %vm523_vm1, %v505_v36, 0.0 }
  0xdb   : > { %v475_v17 = vpop.f32.mrf.mxu2 }
  0xdc   : > { %v490_v18 = vpop.f32.mrf.mxu3  ;;  %v476_v40 = vadd.f32 %v1477_v25, %v475_v17 }
  0xdd   : > { %v467_v19 = vpop.f32.mrf.mxu0  ;;  %v491_v48 = vadd.f32 %v1477_v25, %v490_v18 }
  0xde   : > { %v468_v28 = vadd.f32 %v1477_v25, %v467_v19  ;;  %v509_v51 = vmax.f32 %v476_v40, 0.0 }
  0xdf   : > { %v515_v62 = vmax.f32 %v491_v48, 0.0 }
  0xe0   : > { %v506_v37 = vmax.f32 %v468_v28, 0.0  ;;  %v533_v1 = vsel %vm523_vm1, %v509_v51, 0.0 }
  0xe1   : > { %v539_v11 = vsel %vm523_vm1, %v515_v62, 0.0 }
  0xe2   : > { %v530_v49 = vsel %vm524_vm0, %v506_v37, 0.0 }
  0xe3   : > { %v477_v21 = vpop.f32.mrf.mxu2  ;;  %v545_v57 = vmax.f32 %v529_v47, %v530_v49 }
  0xe4   : > { %v492_v22 = vpop.f32.mrf.mxu3  ;;  %v478_v33 = vadd.f32 %v1477_v25, %v477_v21 }
  0xe5   : > { %v470_v23 = vpop.f32.mrf.mxu0  ;;  %v493_v42 = vadd.f32 %v1477_v25, %v492_v22  ;;  %v546_v8 = vrot.slane %v545_v57, 4  ;;  %v982_v22 = vld [vmem:[#allocation8] sm:$0xff] }
  0xe6   : > { %v471_v26 = vadd.f32 %v1477_v25, %v470_v23  ;;  %v510_v43 = vmax.f32 %v478_v33, 0.0  ;;  %716 = vmatpush.bf16.msra.mxu1 %v982_v22 }
  0xe7   : > { %v516_v54 = vmax.f32 %v493_v42, 0.0  ;;  %v547_v23 = vmax.f32 %v545_v57, %v546_v8 }
  0xe8   : > { %v507_v34 = vmax.f32 %v471_v26, 0.0  ;;  %v534_v58 = vsel %vm524_vm0, %v510_v43, 0.0 }
  0xe9   : > { %v559_v5 = vmax.f32 %v533_v1, %v534_v58  ;;  %v540_v6 = vsel %vm524_vm0, %v516_v54, 0.0  ;;  %v548_v33 = vrot.slane %v547_v23, 2 }
  0xea   : > { %v531_v44 = vsel %vm523_vm1, %v507_v34, 0.0  ;;  %v580_v15 = vmax.f32 %v539_v11, %v540_v6 }
  0xeb   : > { %v480_v31 = vpop.f32.mrf.mxu2  ;;  %v560_v18 = vrot.slane %v559_v5, 4  ;;  %v549_v42 = vmax.f32 %v547_v23, %v548_v33 }
  0xec   : > { %v495_v35 = vpop.f32.mrf.mxu3  ;;  %v481_v45 = vadd.f32 %v1477_v25, %v480_v31  ;;  %v581_v26 = vrot.slane %v580_v15, 4 }
  0xed   : > { %v472_v38 = vpop.f32.mrf.mxu0  ;;  %v496_v52 = vadd.f32 %v1477_v25, %v495_v35  ;;  %v561_v29 = vmax.f32 %v559_v5, %v560_v18 }
  0xee   : > { %v473_v41 = vadd.f32 %v1477_v25, %v472_v38  ;;  %v511_v59 = vmax.f32 %v481_v45, 0.0  ;;  %v582_v36 = vmax.f32 %v580_v15, %v581_v26 }
  0xef   : > { %v517_v2 = vmax.f32 %v496_v52, 0.0  ;;  %v562_v39 = vrot.slane %v561_v29, 2 }
  0xf0   : > { %v508_v46 = vmax.f32 %v473_v41, 0.0  ;;  %v535_v9 = vsel %vm523_vm1, %v511_v59, 0.0  ;;  %v583_v48 = vrot.slane %v582_v36, 2 }
  0xf1   : > { %v541_v16 = vsel %vm523_vm1, %v517_v2, 0.0  ;;  %v563_v52 = vmax.f32 %v561_v29, %v562_v39 }
  0xf2   : > { %v532_v53 = vsel %vm524_vm0, %v508_v46, 0.0 }
  0xf3   : > { %v552_v55 = vmax.f32 %v531_v44, %v532_v53  ;;  %v482_v56 = vpop.f32.mrf.mxu2  ;;  %v564_v0 = vrot.slane %v563_v52, 1 }
  0xf4   : > { %v483_v60 = vadd.f32 %v1477_v25, %v482_v56  ;;  %v497_v61 = vpop.f32.mrf.mxu3 }
  0xf5   : > { %v498_v63 = vadd.f32 %v1477_v25, %v497_v61  ;;  %v553_v3 = vrot.slane %v552_v55, 4  ;;  %v565_v32 = vmax.f32 %v563_v52, %v564_v0 }
  0xf6   : > { %v512_v4 = vmax.f32 %v483_v60, 0.0  ;;  %v584_v60 = vmax.f32 %v582_v36, %v583_v48 }
  0xf7   : > { %v518_v7 = vmax.f32 %v498_v63, 0.0  ;;  %v554_v17 = vmax.f32 %v552_v55, %v553_v3  ;;  %v550_v55 = vrot.slane %v549_v42, 1  ;;  %v603_v18 = vpack.c.bf16 %v565_v32, %v565_v32 }
  0xf8   : > { %v536_v10 = vsel %vm524_vm0, %v512_v4, 0.0  ;;  %v585_v6 = vrot.slane %v584_v60, 1 }
  0xf9   : > { %v566_v12 = vmax.f32 %v535_v9, %v536_v10  ;;  %v542_v13 = vsel %vm524_vm0, %v518_v7, 0.0  ;;  %v555_v27 = vrot.slane %v554_v17, 2  ;;  %v551_v3 = vmax.f32 %v549_v42, %v550_v55 }
  0xfa   : > { %v587_v20 = vmax.f32 %v541_v16, %v542_v13  ;;  %v586_v14 = vmax.f32 %v584_v60, %v585_v6  ;;  %v639_v29 = vunpack.c.l.b16 %v603_v18 }
  0xfb   : > { %v567_v19 = vrot.slane %v566_v12, 4  ;;  %v485_v21 = vpop.f32.mrf.mxu2  ;;  %v556_v37 = vmax.f32 %v554_v17, %v555_v27 }
  0xfc   : > { %v500_v24 = vpop.f32.mrf.mxu3  ;;  %v588_v31 = vrot.slane %v587_v20, 4  ;;  %v486_v34 = vadd.f32 %v1477_v25, %v485_v21 }
  0xfd   : > { %v568_v28 = vmax.f32 %v566_v12, %v567_v19  ;;  %v501_v35 = vadd.f32 %v1477_v25, %v500_v24  ;;  %v557_v49 = vrot.slane %v556_v37, 1  ;;  %v601_v12 = vpack.c.bf16 %v551_v3, %v551_v3 }
  0xfe   : > { %v589_v40 = vmax.f32 %v587_v20, %v588_v31  ;;  %v513_v43 = vmax.f32 %v486_v34, 0.0  ;;  %v606_v24 = vpack.c.bf16 %v586_v14, %v586_v14 }
  0xff   : > { %v569_v38 = vrot.slane %v568_v28, 2  ;;  %v519_v46 = vmax.f32 %v501_v35, 0.0  ;;  %v558_v61 = vmax.f32 %v556_v37, %v557_v49  ;;  %v637_v21 = vunpack.c.l.b16 %v601_v12 }
 0x100   : > { %v590_v53 = vrot.slane %v589_v40, 2  ;;  %v537_v56 = vsel %vm523_vm1, %v513_v43, 0.0  ;;  %v642_v37 = vunpack.c.l.b16 %v606_v24 }
 0x101   : > { %v570_v50 = vmax.f32 %v568_v28, %v569_v38  ;;  %v543_v58 = vsel %vm523_vm1, %v519_v46, 0.0  ;;  %v602_v7 = vpack.c.bf16 %v558_v61, %v558_v61  ;;  %v1088_v46 = vld [vmem:[%s1574_s5] ss:$0 sm:$0xff] }
 0x102   : > { %v591_v1 = vmax.f32 %v589_v40, %v590_v53 }
 0x103   : > { %v487_v41 = vpop.f32.mrf.mxu2  ;;  %v571_v62 = vrot.slane %v570_v50, 1  ;;  %v638_v15 = vunpack.c.l.b16 %v602_v7 }
 0x104   : > { %v488_v44 = vadd.f32 %v1477_v25, %v487_v41  ;;  %v502_v45 = vpop.f32.mrf.mxu3  ;;  %v592_v10 = vrot.slane %v591_v1, 1 }
 0x105   : > { %v503_v47 = vadd.f32 %v1477_v25, %v502_v45  ;;  %v572_v8 = vmax.f32 %v570_v50, %v571_v62  ;;  %v646_v28 = vsel %vm645_vm2, %v638_v15, %v637_v21 }
 0x106   : > { %v514_v51 = vmax.f32 %v488_v44, 0.0  ;;  %v593_v20 = vmax.f32 %v591_v1, %v592_v10  ;;  %v648_v36 = vsel %vm647_vm3, %v639_v29, %v646_v28 }
 0x107   : > { %v520_v54 = vmax.f32 %v503_v47, 0.0  ;;  %v604_v16 = vpack.c.bf16 %v572_v8, %v572_v8 }
 0x108   : > { %v538_v57 = vsel %vm524_vm0, %v514_v51, 0.0  ;;  %v607_v33 = vpack.c.bf16 %v593_v20, %v593_v20 }
 0x109   : > { %v573_v59 = vmax.f32 %v537_v56, %v538_v57  ;;  %v544_v25 = vsel %vm524_vm0, %v520_v54, 0.0  ;;  %v640_v26 = vunpack.c.l.b16 %v604_v16 }
 0x10a   : > { %v594_v63 = vmax.f32 %v543_v58, %v544_v25  ;;  %v643_v39 = vunpack.c.l.b16 %v607_v33 }
 0x10b   : > { %v574_v2 = vrot.slane %v573_v59, 4  ;;  %v650_v38 = vsel %vm649_vm4, %v640_v26, %v648_v36 }
 0x10c   : > { %v595_v4 = vrot.slane %v594_v63, 4 }
 0x10d   : > { %v575_v5 = vmax.f32 %v573_v59, %v574_v2 }
 0x10e   : > { %v596_v9 = vmax.f32 %v594_v63, %v595_v4 }
 0x10f   : > { %v576_v11 = vrot.slane %v575_v5, 2 }
 0x110   : > { %v597_v30 = vrot.slane %v596_v9, 2 }
 0x111   : > { %v577_v13 = vmax.f32 %v575_v5, %v576_v11 }
 0x112   : > { %v598_v17 = vmax.f32 %v596_v9, %v597_v30 }
 0x113   : > { %v578_v19 = vrot.slane %v577_v13, 1 }
 0x114   : > { %v599_v22 = vrot.slane %v598_v17, 1 }
 0x115   : > { %v579_v23 = vmax.f32 %v577_v13, %v578_v19 }
 0x116   : > { %v600_v27 = vmax.f32 %v598_v17, %v599_v22 }
 0x117   : > { %v605_v31 = vpack.c.bf16 %v579_v23, %v579_v23 }
 0x118   : > { %v608_v34 = vpack.c.bf16 %v600_v27, %v600_v27 }
 0x119   : > { %v641_v35 = vunpack.c.l.b16 %v605_v31 }
 0x11a   : > { %v644_v41 = vunpack.c.l.b16 %v608_v34 }
 0x11b   : > { %v652_v40 = vsel %vm651_vm5, %v641_v35, %v650_v38 }
 0x11c   : > { %v654_v42 = vsel %vm653_vm6, %v642_v37, %v652_v40 }
 0x11d   : > { %v656_v43 = vsel %vm655_vm7, %v643_v39, %v654_v42 }
 0x11e   : > { %v658_v44 = vsel %vm657_vm8, %v644_v41, %v656_v43 }
 0x11f   : > { %v659_v45 = vpack.c.b16 %v658_v44, %v658_v44 }
 0x121   : > { %717 = vmatmul.bf16.vlgmr.msra.gmra.mxu1 %v659_v45 }
 0x19e   : > { %v718_v47 = vpop.f32.mrf.mxu1 }
 0x19f   : > { %v719_v48 = vadd.f32 %v1088_v46, %v718_v47 }
 0x1a1   : > { %722 = vmax.xlane.f32.xlu0 %v719_v48 }
 0x1a6   : > { %v720_v49 = vpop.f32.mrf.mxu1 }
 0x214   : > { %v723_v50 = vpop.xlane.xlu0 %722 }
 0x215   : > { %v724_v51 = vsub.f32 %v719_v48, %v723_v50 }
 0x217   : > { %v725_v52 = vmul.f32 1.442695, %v724_v51 }
 0x219   : > { %1089 = vpow2.f32 %v725_v52 }
 0x21f   : > { %v1090_v53 = vpop.eup %1089 }
 0x220   : > { %727 = vadd.xlane.f32.xlu0 %v1090_v53 }
 0x293   : > { %v728_v54 = vpop.xlane.xlu0 %727 }
 0x294   : > { %1091 = vlog2.f32 %v728_v54 }
 0x29a   : > { %v1092_v55 = vpop.eup %1091 }
 0x29b   : > { %v730_v56 = vmul.f32 0.6931472, %v1092_v55 }
 0x29d   : > { %v731_v57 = vsub.f32 %v724_v51, %v730_v56 }
 0x29f   : > { %732 = vst [vmem:[%s322_s11] sm:$0xff] %v731_v57 }
 0x2a0   : > { %1240 = shalt.err (!%p1237_p10)
}
 0x2a1   : > { %1020 = dma.vmem_to_hbm [thread:$0]  (%p1418_p0), %s747_s7, 128, %s749_s15, %s734_s16  }
 0x2a2 PF: > { %p1047_p11 = scmp.ge.s32.totalorder %s1287_s24, 2  ;;  %s760_s18 = sand.u32 1, %s1275_s21  }
 0x2a3   : > { %s761_s13 = scalar_lea.sflag [#allocation4], %s760_s18 }
 0x2a4   : > { %p1037_p12 = pnand %p1047_p11, %p1366_p6 }
 0x2a6   : > { %p1038_p13 = pneg %p1037_p12 }
 0x2a8   : > { %1270 = dma.done.wait (%p1038_p13), %s761_s13, 128  }
 0x2a9   : > { %1272 = vsyncadd (%p1038_p13), %s761_s13, 4294967168  ;;  %p21_p3 = scmp.ge.s32.totalorder %s1405_s10, 6   ;;  %s1586_s21 = smov %s1279_s22 }
 0x2aa   : > { %s1587_s22 = smov %s1283_s23  ;;  %s1588_s23 = smov %s1414_s14 }
 0x2ab   : > { %s1589_s24 = smov %s1405_s10  ;;  %23 = sbr.rel (!%p21_p3) target bundleno = 7 (0x7), region = 101 }
 0x2b0   :  { %767 = vsyncpa [#allocation3], 1 }
 0x2b1   :  { %769 = vsyncpa [#allocation3 + $0x1], 1 }
 0x2b2   :  { %770 = vsyncpa [#allocation6], 1 }
 0x2b3   :  { %771 = vsyncpa [#allocation9], 1 }
 0x2b4   :  { %772 = vsyncpa [#allocation4], 1 }
 0x2b5   :  { %774 = vsyncpa [#allocation4 + $0x1], 1 }

</bundles_post_ra>
